<compile_context>
chip_gen: v7x
topology: tpu7x:2x2x1
jax: 0.10.0
libtpu: 0.0.40
codegen_flags: <defaults>
</compile_context>

<pallas_src>
import jax
import jax.numpy as jnp
from jax import lax
from jax.experimental import pallas as pl
from jax.experimental.pallas import tpu as pltpu

# ----------------------------- config (small) -------------------------------
BATCH   = 2
SEQ     = 8
HIDDEN  = 32
FF      = 4 * HIDDEN
LAYERS  = 2
VOCAB   = 64
N_SEG   = 2


# ------------------------------ small helpers -------------------------------
def _r8(n):  return -(-n // 8) * 8
def _r16(n): return -(-n // 16) * 16


def _layout(B, S, H, FFD, L):
    """Shared slab layout (row offsets) used by pack_inputs() and the kernel."""
    BS = B * S
    HPAD = -(-H // 128) * 128                 # lane-aligned imag-block offset
    lay = dict(HPAD=HPAD,
               QW=max(2 * HPAD, FFD, 2 * BS, H),    # bf16 slab lane width
               PW=max(128, FFD, H, BS))             # f32  slab lane width
    # --- bf16 slab (row offsets multiples of 16) ---
    q = 0
    lay["q_fs"] = q; q += _r16(BS)             # [kron(I,Fsr) | kron(I,-Fsi)]
    lay["q_fh"] = q; q += _r16(H)              # [Fhr | 0 | Fhi | 0]
    lay["q_w1"] = q; q += L * _r16(H)          # per-layer (H, FF)
    lay["q_w2"] = q; q += L * _r16(FFD)        # per-layer (FF, H)
    lay["q_rows"] = q
    # --- f32 slab (row offsets multiples of 8) ---
    lay["r_misc"]  = 0                         # emb_g, emb_b, bfc, wd^T, bc_pad
    lay["r_layer"] = 8                         # 8 rows per layer: ln1g/b, ln2g/b, b2, b1
    r = 8 + 8 * L
    lay["r_sel"] = r; r += _r8(B)              # (B, BS) one-hot CLS selector
    lay["r_wfc"] = r; r += _r8(H)              # fc weight (H, H)
    lay["r_wc"]  = r; r += _r8(H)              # classifier weight, lane-padded (H, 128)
    lay["r_rows"] = r
    return lay


def _layernorm(x, g, b, eps=1e-12):
    mu = jnp.mean(x, axis=-1, keepdims=True)
    xc = x - mu
    var = jnp.mean(xc * xc, axis=-1, keepdims=True)
    return xc * lax.rsqrt(var + eps) * g + b


def _gelu(x):
    # TODO(synk): models.gelu is the exact erf-GELU; tanh approximation used here.
    c = 0.7978845608028654
    return 0.5 * x * (1.0 + jnp.tanh(c * (x + 0.044715 * x * x * x)))


# --------------------------------- kernel -----------------------------------
def _make_disc_kernel(B, S, H, FFD, L, lay):
    BS = B * S
    HPAD = lay["HPAD"]
    f32, bf16 = jnp.float32, jnp.bfloat16

    def kernel(x_ref, wbf_ref, wf_ref, out_ref):
        # ---- hoisted loads (static, aligned ref slices are free) ----
        mv = wf_ref[0:8, :]                                   # misc f32 block
        emb_g, emb_b = mv[0:1, :H], mv[1:2, :H]
        bfc, wd_row, bc_pad = mv[2:3, :H], mv[3:4, :H], mv[4:5, :]
        fs = wbf_ref[lay["q_fs"]:lay["q_fs"] + BS, :2 * BS]   # (BS, 2BS) bf16
        fh = wbf_ref[lay["q_fh"]:lay["q_fh"] + H, :]          # (H, 2*HPAD) bf16

        # embedding LayerNorm over all B*S rows at once
        x = _layernorm(x_ref[...], emb_g, emb_b)              # (BS, H) f32

        # NOTE: static unroll is fine at L=2; switch to lax.fori_loop / a layer
        # grid axis with streamed weights when L grows (see TODO at top).
        for l in range(L):
            # --- FNet token mixing: Re(Fs @ X @ Fh), 2 MXU dots ---
            # y = [X Fhr | 0 | X Fhi | 0]  (imag block starts at lane HPAD)
            y = jnp.dot(x.astype(bf16), fh, preferred_element_type=f32)   # (BS, 2*HPAD)
            z = jnp.concatenate([y[:, :HPAD], y[:, HPAD:]], axis=0)       # (2BS, HPAD)
            # minus sign folded into fs -> single dot, take the H live lanes
            mix = jnp.dot(fs, z.astype(bf16),
                          preferred_element_type=f32)[:, :H]              # (BS, H)

            lv = wf_ref[lay["r_layer"] + 8 * l:lay["r_layer"] + 8 * l + 8, :]
            ln1g, ln1b = lv[0:1, :H], lv[1:2, :H]
            ln2g, ln2b = lv[2:3, :H], lv[3:4, :H]
            b2, b1 = lv[4:5, :H], lv[5:6, :FFD]

            x = _layernorm(x + mix, ln1g, ln1b)

            # --- position-wise FFN (H -> 4H -> H), GELU ---
            r1 = lay["q_w1"] + l * _r16(H)
            r2 = lay["q_w2"] + l * _r16(FFD)
            w1 = wbf_ref[r1:r1 + H, :FFD]                      # (H, FF) bf16
            w2 = wbf_ref[r2:r2 + FFD, :H]                      # (FF, H) bf16
            h1 = _gelu(jnp.dot(x.astype(bf16), w1, preferred_element_type=f32) + b1)
            h2 = jnp.dot(h1.astype(bf16), w2, preferred_element_type=f32) + b2
            x = _layernorm(x + h2, ln2g, ln2b)

        # ---- discriminator head: Linear(H -> 1, no bias), lane-oriented ----
        tok = lax.dot_general(wd_row, x, (((1,), (1,)), ((), ())),
                              preferred_element_type=f32)      # (1, BS)

        # ---- pooled CLS head via one-hot selector matmul ----
        sel = wf_ref[lay["r_sel"]:lay["r_sel"] + B, :BS]        # (B, BS) f32
        cls = jnp.dot(sel, x, preferred_element_type=f32)       # (B, H)
        wfc = wf_ref[lay["r_wfc"]:lay["r_wfc"] + H, :H]
        cls_h = jnp.tanh(jnp.dot(cls, wfc, preferred_element_type=f32) + bfc)
        wc_pad = wf_ref[lay["r_wc"]:lay["r_wc"] + H, :]          # (H, 128), zero-padded
        clsf = jnp.dot(cls_h, wc_pad, preferred_element_type=f32) + bc_pad  # (B, 128)

        # ---- single merged output buffer (one output DMA) ----
        out_ref[0:1, 0:BS] = tok                # row 0: token logits (transposed)
        out_ref[1:1 + B, :] = clsf              # rows 1..B: lane-padded cls logits

    return kernel


# ------------------------------ params & packing -----------------------------
def init_params(key):
    ks = jax.random.split(key, 8)
    nrm = lambda k, s: (0.02 * jax.random.normal(k, s)).astype(jnp.float32)
    return dict(
        tok_emb=nrm(ks[0], (VOCAB, HIDDEN)),
        pos_emb=nrm(ks[1], (SEQ, HIDDEN)),
        seg_emb=nrm(ks[2], (N_SEG, HIDDEN)),
        emb_g=jnp.ones((1, HIDDEN), jnp.float32),
        emb_b=jnp.zeros((1, HIDDEN), jnp.float32),
        w1=nrm(ks[3], (LAYERS, HIDDEN, FF)),
        b1=jnp.zeros((LAYERS, FF), jnp.float32),
        w2=nrm(ks[4], (LAYERS, FF, HIDDEN)),
        b2=jnp.zeros((LAYERS, HIDDEN), jnp.float32),
        ln1g=jnp.ones((LAYERS, HIDDEN), jnp.float32),
        ln1b=jnp.zeros((LAYERS, HIDDEN), jnp.float32),
        ln2g=jnp.ones((LAYERS, HIDDEN), jnp.float32),
        ln2b=jnp.zeros((LAYERS, HIDDEN), jnp.float32),
        wfc=nrm(ks[5], (HIDDEN, HIDDEN)),          # fc: Linear(H, H) (in, out) layout
        bfc=jnp.zeros((1, HIDDEN), jnp.float32),
        wd=nrm(ks[6], (HIDDEN, 1)),                # discriminator: Linear(H, 1, bias=False)
        wc=nrm(ks[7], (HIDDEN, 2)),                # classifier: Linear(H, 2)
        bc=jnp.zeros((1, 2), jnp.float32),
    )


def _dft_real_imag(n):
    k = jnp.arange(n, dtype=jnp.float32)
    ang = -2.0 * jnp.pi * jnp.outer(k, k) / n
    return jnp.cos(ang), jnp.sin(ang)


def pack_inputs(params, batch, seq):
    """One-time packing: DFT constants + all params fused into 2 slabs."""
    H, FFD, L = HIDDEN, FF, LAYERS
    BS = batch * seq
    lay = _layout(batch, seq, H, FFD, L)
    HPAD, QW, PW = lay["HPAD"], lay["QW"], lay["PW"]

    fsr, fsi = _dft_real_imag(seq)
    fhr, fhi = _dft_real_imag(H)
    eye_b = jnp.eye(batch, dtype=jnp.float32)
    # real/imag combination folded into the sequence-side constant: (BS, 2*BS)
    fs_cat = jnp.concatenate([jnp.kron(eye_b, fsr), jnp.kron(eye_b, -fsi)], axis=1)

    # --- bf16 slab: seq DFT, hidden DFT, all FFN weights ---
    wbf = jnp.zeros((lay["q_rows"], QW), jnp.float32)
    wbf = wbf.at[lay["q_fs"]:lay["q_fs"] + BS, :2 * BS].set(fs_cat)
    wbf = wbf.at[lay["q_fh"]:lay["q_fh"] + H, :H].set(fhr)
    wbf = wbf.at[lay["q_fh"]:lay["q_fh"] + H, HPAD:HPAD + H].set(fhi)
    for l in range(L):
        r1 = lay["q_w1"] + l * _r16(H)
        r2 = lay["q_w2"] + l * _r16(FFD)
        wbf = wbf.at[r1:r1 + H, :FFD].set(params["w1"][l])
        wbf = wbf.at[r2:r2 + FFD, :H].set(params["w2"][l])
    wbf = wbf.astype(jnp.bfloat16)

    # --- f32 slab: LN params, biases, selector, heads ---
    wf = jnp.zeros((lay["r_rows"], PW), jnp.float32)
    wf = wf.at[0, :H].set(params["emb_g"][0])
    wf = wf.at[1, :H].set(params["emb_b"][0])
    wf = wf.at[2, :H].set(params["bfc"][0])
    wf = wf.at[3, :H].set(params["wd"][:, 0])          # wd^T
    wf = wf.at[4, :2].set(params["bc"][0])             # bc, lane-padded with zeros
    for l in range(L):
        r = lay["r_layer"] + 8 * l
        wf = wf.at[r + 0, :H].set(params["ln1g"][l])
        wf = wf.at[r + 1, :H].set(params["ln1b"][l])
        wf = wf.at[r + 2, :H].set(params["ln2g"][l])
        wf = wf.at[r + 3, :H].set(params["ln2b"][l])
        wf = wf.at[r + 4, :H].set(params["b2"][l])
        wf = wf.at[r + 5, :FFD].set(params["b1"][l])
    sel = jnp.zeros((batch, BS), jnp.float32)
    sel = sel.at[jnp.arange(batch), jnp.arange(batch) * seq].set(1.0)   # CLS selector
    wf = wf.at[lay["r_sel"]:lay["r_sel"] + batch, :BS].set(sel)
    wf = wf.at[lay["r_wfc"]:lay["r_wfc"] + H, :H].set(params["wfc"])
    wf = wf.at[lay["r_wc"]:lay["r_wc"] + H, :2].set(params["wc"])       # lane-padded

    return dict(tok_emb=params["tok_emb"], pos_emb=params["pos_emb"],
                seg_emb=params["seg_emb"], wbf=wbf, wf32=wf)


# ------------------------------ JAX glue / wrapper ---------------------------
def discriminator_forward(packed, input_ids, segment_ids, input_mask):
    # TODO(synk): input_mask is unused — the assumed FNet-style Fourier mixing
    # (models.FourierFormer source unavailable) has no attention mask.
    del input_mask
    B, S = input_ids.shape
    H = packed["tok_emb"].shape[1]
    lay = _layout(B, S, H, FF, LAYERS)

    # TODO(synk): embedding gathers kept in XLA glue; fuse via scalar-prefetch
    # row gather once B*S*H is large enough for the extra HBM round trip to matter.
    x_emb = (jnp.take(packed["tok_emb"], input_ids, axis=0)
             + packed["pos_emb"][None, :S, :]
             + jnp.take(packed["seg_emb"], segment_ids, axis=0)).astype(jnp.float32)
    x_flat = x_emb.reshape(B * S, H)

    vmem = pl.BlockSpec(memory_space=pltpu.MemorySpace.VMEM)
    out = pl.pallas_call(
        _make_disc_kernel(B, S, H, FF, LAYERS, lay),
        out_shape=jax.ShapeDtypeStruct((_r8(1 + B), 128), jnp.float32),
        in_specs=[vmem, vmem, vmem],
        out_specs=vmem,
        compiler_params=pltpu.CompilerParams(vmem_limit_bytes=32 * 1024 * 1024),
    )(x_flat, packed["wbf"], packed["wf32"])

    logits = out[0, :B * S].reshape(B, S, 1)     # matches nn.Linear(H, 1) output
    logits_clsf = out[1:1 + B, :2]               # matches nn.Linear(H, 2) output
    return logits, logits_clsf


# ----------------------------------- main ------------------------------------
if __name__ == "__main__":
    key = jax.random.PRNGKey(0)
    kp, k_ids, k_seg = jax.random.split(key, 3)

    params = init_params(kp)
    packed = pack_inputs(params, BATCH, SEQ)     # one-time packing + DFT constants

    input_ids = jax.random.randint(k_ids, (BATCH, SEQ), 0, VOCAB, dtype=jnp.int32)
    segment_ids = jax.random.randint(k_seg, (BATCH, SEQ), 0, N_SEG, dtype=jnp.int32)
    input_mask = jnp.ones((BATCH, SEQ), dtype=jnp.int32)

    fwd = jax.jit(discriminator_forward)
    logits, logits_clsf = fwd(packed, input_ids, segment_ids, input_mask)
    jax.block_until_ready((logits, logits_clsf))

    assert logits.shape == (BATCH, SEQ, 1)
    assert logits_clsf.shape == (BATCH, 2)
    assert bool(jnp.all(jnp.isfinite(logits))) and bool(jnp.all(jnp.isfinite(logits_clsf)))
    print("KERNEL_OK")
</pallas_src>

<mosaic_0001>
module attributes {stable_mosaic.version = 11 : i64} {
  func.func @kernel(%arg0: memref<16x32xf32, #tpu.memory_space<vmem>>, %arg1: memref<368x256xbf16, #tpu.memory_space<vmem>>, %arg2: memref<96x128xf32, #tpu.memory_space<vmem>>, %arg3: memref<8x128xf32, #tpu.memory_space<vmem>>) attributes {dimension_semantics = [], scalar_prefetch = 0 : i64, scratch_operands = 0 : i64, tpu.core_type = #tpu.core_type<tc>} {
    %c0 = arith.constant 0 : index
    %c0_0 = arith.constant 0 : index
    %0 = vector.load %arg2[%c0, %c0_0] : memref<96x128xf32, #tpu.memory_space<vmem>>, vector<8x128xf32>
    %1 = vector.extract_strided_slice %0 {offsets = [0, 0], sizes = [1, 32], strides = [1, 1]} : vector<8x128xf32> to vector<1x32xf32>
    %2 = vector.extract_strided_slice %0 {offsets = [1, 0], sizes = [1, 32], strides = [1, 1]} : vector<8x128xf32> to vector<1x32xf32>
    %3 = vector.extract_strided_slice %0 {offsets = [2, 0], sizes = [1, 32], strides = [1, 1]} : vector<8x128xf32> to vector<1x32xf32>
    %4 = vector.extract_strided_slice %0 {offsets = [3, 0], sizes = [1, 32], strides = [1, 1]} : vector<8x128xf32> to vector<1x32xf32>
    %5 = vector.extract_strided_slice %0 {offsets = [4, 0], sizes = [1, 128], strides = [1, 1]} : vector<8x128xf32> to vector<1x128xf32>
    %c0_1 = arith.constant 0 : index
    %c0_2 = arith.constant 0 : index
    %6 = vector.load %arg1[%c0_1, %c0_2] : memref<368x256xbf16, #tpu.memory_space<vmem>>, vector<16x32xbf16>
    %c16 = arith.constant 16 : index
    %c0_3 = arith.constant 0 : index
    %7 = vector.load %arg1[%c16, %c0_3] : memref<368x256xbf16, #tpu.memory_space<vmem>>, vector<32x256xbf16>
    %c0_4 = arith.constant 0 : index
    %c0_5 = arith.constant 0 : index
    %8 = vector.load %arg0[%c0_4, %c0_5] : memref<16x32xf32, #tpu.memory_space<vmem>>, vector<16x32xf32>
    %cst = arith.constant dense<0.000000e+00> : vector<16xf32>
    %9 = vector.multi_reduction <add>, %8, %cst [1] : vector<16x32xf32> to vector<16xf32>
    %10 = vector.shape_cast %9 : vector<16xf32> to vector<16x1xf32>
    %cst_6 = arith.constant 3.200000e+01 : f32
    %11 = vector.broadcast %cst_6 : f32 to vector<16x1xf32>
    %12 = arith.divf %10, %11 : vector<16x1xf32>
    %13 = vector.broadcast %12 : vector<16x1xf32> to vector<16x32xf32>
    %14 = arith.subf %8, %13 : vector<16x32xf32>
    %15 = arith.mulf %14, %14 : vector<16x32xf32>
    %cst_7 = arith.constant dense<0.000000e+00> : vector<16xf32>
    %16 = vector.multi_reduction <add>, %15, %cst_7 [1] : vector<16x32xf32> to vector<16xf32>
    %17 = vector.shape_cast %16 : vector<16xf32> to vector<16x1xf32>
    %cst_8 = arith.constant 3.200000e+01 : f32
    %18 = vector.broadcast %cst_8 : f32 to vector<16x1xf32>
    %19 = arith.divf %17, %18 : vector<16x1xf32>
    %cst_9 = arith.constant 9.99999996E-13 : f32
    %20 = vector.broadcast %cst_9 : f32 to vector<16x1xf32>
    %21 = arith.addf %19, %20 : vector<16x1xf32>
    %22 = math.rsqrt %21 : vector<16x1xf32>
    %23 = vector.broadcast %22 : vector<16x1xf32> to vector<16x32xf32>
    %24 = arith.mulf %14, %23 : vector<16x32xf32>
    %25 = vector.broadcast %1 : vector<1x32xf32> to vector<16x32xf32>
    %26 = arith.mulf %24, %25 : vector<16x32xf32>
    %27 = vector.broadcast %2 : vector<1x32xf32> to vector<16x32xf32>
    %28 = arith.addf %26, %27 : vector<16x32xf32>
    %29 = arith.truncf %28 : vector<16x32xf32> to vector<16x32xbf16>
    %cst_10 = arith.constant dense<0.000000e+00> : vector<16x256xf32>
    %30 = tpu.matmul %29, %7, %cst_10 {dimension_numbers = #tpu.dot_dimension_numbers<[1], [0], [0], [1], [0, 0, 1, 1], [], []>} : vector<16x32xbf16>, vector<32x256xbf16>, vector<16x256xf32> -> vector<16x256xf32>
    %31 = vector.extract_strided_slice %30 {offsets = [0, 0], sizes = [16, 128], strides = [1, 1]} : vector<16x256xf32> to vector<16x128xf32>
    %32 = vector.extract_strided_slice %30 {offsets = [0, 128], sizes = [16, 128], strides = [1, 1]} : vector<16x256xf32> to vector<16x128xf32>
    %33 = tpu.concatenate %31, %32 in 0 : vector<16x128xf32>, vector<16x128xf32> -> vector<32x128xf32>
    %34 = arith.truncf %33 : vector<32x128xf32> to vector<32x128xbf16>
    %cst_11 = arith.constant dense<0.000000e+00> : vector<16x128xf32>
    %35 = tpu.matmul %6, %34, %cst_11 {dimension_numbers = #tpu.dot_dimension_numbers<[1], [0], [0], [1], [0, 0, 1, 1], [], []>} : vector<16x32xbf16>, vector<32x128xbf16>, vector<16x128xf32> -> vector<16x128xf32>
    %36 = vector.extract_strided_slice %35 {offsets = [0, 0], sizes = [16, 32], strides = [1, 1]} : vector<16x128xf32> to vector<16x32xf32>
    %c8 = arith.constant 8 : index
    %c0_12 = arith.constant 0 : index
    %37 = vector.load %arg2[%c8, %c0_12] : memref<96x128xf32, #tpu.memory_space<vmem>>, vector<8x128xf32>
    %38 = vector.extract_strided_slice %37 {offsets = [0, 0], sizes = [1, 32], strides = [1, 1]} : vector<8x128xf32> to vector<1x32xf32>
    %39 = vector.extract_strided_slice %37 {offsets = [1, 0], sizes = [1, 32], strides = [1, 1]} : vector<8x128xf32> to vector<1x32xf32>
    %40 = vector.extract_strided_slice %37 {offsets = [2, 0], sizes = [1, 32], strides = [1, 1]} : vector<8x128xf32> to vector<1x32xf32>
    %41 = vector.extract_strided_slice %37 {offsets = [3, 0], sizes = [1, 32], strides = [1, 1]} : vector<8x128xf32> to vector<1x32xf32>
    %42 = vector.extract_strided_slice %37 {offsets = [4, 0], sizes = [1, 32], strides = [1, 1]} : vector<8x128xf32> to vector<1x32xf32>
    %43 = vector.extract_strided_slice %37 {offsets = [5, 0], sizes = [1, 128], strides = [1, 1]} : vector<8x128xf32> to vector<1x128xf32>
    %44 = arith.addf %28, %36 : vector<16x32xf32>
    %cst_13 = arith.constant dense<0.000000e+00> : vector<16xf32>
    %45 = vector.multi_reduction <add>, %44, %cst_13 [1] : vector<16x32xf32> to vector<16xf32>
    %46 = vector.shape_cast %45 : vector<16xf32> to vector<16x1xf32>
    %cst_14 = arith.constant 3.200000e+01 : f32
    %47 = vector.broadcast %cst_14 : f32 to vector<16x1xf32>
    %48 = arith.divf %46, %47 : vector<16x1xf32>
    %49 = vector.broadcast %48 : vector<16x1xf32> to vector<16x32xf32>
    %50 = arith.subf %44, %49 : vector<16x32xf32>
    %51 = arith.mulf %50, %50 : vector<16x32xf32>
    %cst_15 = arith.constant dense<0.000000e+00> : vector<16xf32>
    %52 = vector.multi_reduction <add>, %51, %cst_15 [1] : vector<16x32xf32> to vector<16xf32>
    %53 = vector.shape_cast %52 : vector<16xf32> to vector<16x1xf32>
    %cst_16 = arith.constant 3.200000e+01 : f32
    %54 = vector.broadcast %cst_16 : f32 to vector<16x1xf32>
    %55 = arith.divf %53, %54 : vector<16x1xf32>
    %cst_17 = arith.constant 9.99999996E-13 : f32
    %56 = vector.broadcast %cst_17 : f32 to vector<16x1xf32>
    %57 = arith.addf %55, %56 : vector<16x1xf32>
    %58 = math.rsqrt %57 : vector<16x1xf32>
    %59 = vector.broadcast %58 : vector<16x1xf32> to vector<16x32xf32>
    %60 = arith.mulf %50, %59 : vector<16x32xf32>
    %61 = vector.broadcast %38 : vector<1x32xf32> to vector<16x32xf32>
    %62 = arith.mulf %60, %61 : vector<16x32xf32>
    %63 = vector.broadcast %39 : vector<1x32xf32> to vector<16x32xf32>
    %64 = arith.addf %62, %63 : vector<16x32xf32>
    %c48 = arith.constant 48 : index
    %c0_18 = arith.constant 0 : index
    %65 = vector.load %arg1[%c48, %c0_18] : memref<368x256xbf16, #tpu.memory_space<vmem>>, vector<32x128xbf16>
    %c112 = arith.constant 112 : index
    %c0_19 = arith.constant 0 : index
    %66 = vector.load %arg1[%c112, %c0_19] : memref<368x256xbf16, #tpu.memory_space<vmem>>, vector<128x32xbf16>
    %67 = arith.truncf %64 : vector<16x32xf32> to vector<16x32xbf16>
    %cst_20 = arith.constant dense<0.000000e+00> : vector<16x128xf32>
    %68 = tpu.matmul %67, %65, %cst_20 {dimension_numbers = #tpu.dot_dimension_numbers<[1], [0], [0], [1], [0, 0, 1, 1], [], []>} : vector<16x32xbf16>, vector<32x128xbf16>, vector<16x128xf32> -> vector<16x128xf32>
    %69 = vector.broadcast %43 : vector<1x128xf32> to vector<16x128xf32>
    %70 = arith.addf %68, %69 : vector<16x128xf32>
    %cst_21 = arith.constant 5.000000e-01 : f32
    %71 = vector.broadcast %cst_21 : f32 to vector<16x128xf32>
    %72 = arith.mulf %71, %70 : vector<16x128xf32>
    %cst_22 = arith.constant 4.471500e-02 : f32
    %73 = vector.broadcast %cst_22 : f32 to vector<16x128xf32>
    %74 = arith.mulf %73, %70 : vector<16x128xf32>
    %75 = arith.mulf %74, %70 : vector<16x128xf32>
    %76 = arith.mulf %75, %70 : vector<16x128xf32>
    %77 = arith.addf %70, %76 : vector<16x128xf32>
    %cst_23 = arith.constant 0.797884583 : f32
    %78 = vector.broadcast %cst_23 : f32 to vector<16x128xf32>
    %79 = arith.mulf %78, %77 : vector<16x128xf32>
    %80 = math.tanh %79 : vector<16x128xf32>
    %cst_24 = arith.constant 1.000000e+00 : f32
    %81 = vector.broadcast %cst_24 : f32 to vector<16x128xf32>
    %82 = arith.addf %81, %80 : vector<16x128xf32>
    %83 = arith.mulf %72, %82 : vector<16x128xf32>
    %84 = arith.truncf %83 : vector<16x128xf32> to vector<16x128xbf16>
    %cst_25 = arith.constant dense<0.000000e+00> : vector<16x32xf32>
    %85 = tpu.matmul %84, %66, %cst_25 {dimension_numbers = #tpu.dot_dimension_numbers<[1], [0], [0], [1], [0, 0, 1, 1], [], []>} : vector<16x128xbf16>, vector<128x32xbf16>, vector<16x32xf32> -> vector<16x32xf32>
    %86 = vector.broadcast %42 : vector<1x32xf32> to vector<16x32xf32>
    %87 = arith.addf %85, %86 : vector<16x32xf32>
    %88 = arith.addf %64, %87 : vector<16x32xf32>
    %cst_26 = arith.constant dense<0.000000e+00> : vector<16xf32>
    %89 = vector.multi_reduction <add>, %88, %cst_26 [1] : vector<16x32xf32> to vector<16xf32>
    %90 = vector.shape_cast %89 : vector<16xf32> to vector<16x1xf32>
    %cst_27 = arith.constant 3.200000e+01 : f32
    %91 = vector.broadcast %cst_27 : f32 to vector<16x1xf32>
    %92 = arith.divf %90, %91 : vector<16x1xf32>
    %93 = vector.broadcast %92 : vector<16x1xf32> to vector<16x32xf32>
    %94 = arith.subf %88, %93 : vector<16x32xf32>
    %95 = arith.mulf %94, %94 : vector<16x32xf32>
    %cst_28 = arith.constant dense<0.000000e+00> : vector<16xf32>
    %96 = vector.multi_reduction <add>, %95, %cst_28 [1] : vector<16x32xf32> to vector<16xf32>
    %97 = vector.shape_cast %96 : vector<16xf32> to vector<16x1xf32>
    %cst_29 = arith.constant 3.200000e+01 : f32
    %98 = vector.broadcast %cst_29 : f32 to vector<16x1xf32>
    %99 = arith.divf %97, %98 : vector<16x1xf32>
    %cst_30 = arith.constant 9.99999996E-13 : f32
    %100 = vector.broadcast %cst_30 : f32 to vector<16x1xf32>
    %101 = arith.addf %99, %100 : vector<16x1xf32>
    %102 = math.rsqrt %101 : vector<16x1xf32>
    %103 = vector.broadcast %102 : vector<16x1xf32> to vector<16x32xf32>
    %104 = arith.mulf %94, %103 : vector<16x32xf32>
    %105 = vector.broadcast %40 : vector<1x32xf32> to vector<16x32xf32>
    %106 = arith.mulf %104, %105 : vector<16x32xf32>
    %107 = vector.broadcast %41 : vector<1x32xf32> to vector<16x32xf32>
    %108 = arith.addf %106, %107 : vector<16x32xf32>
    %109 = arith.truncf %108 : vector<16x32xf32> to vector<16x32xbf16>
    %cst_31 = arith.constant dense<0.000000e+00> : vector<16x256xf32>
    %110 = tpu.matmul %109, %7, %cst_31 {dimension_numbers = #tpu.dot_dimension_numbers<[1], [0], [0], [1], [0, 0, 1, 1], [], []>} : vector<16x32xbf16>, vector<32x256xbf16>, vector<16x256xf32> -> vector<16x256xf32>
    %111 = vector.extract_strided_slice %110 {offsets = [0, 0], sizes = [16, 128], strides = [1, 1]} : vector<16x256xf32> to vector<16x128xf32>
    %112 = vector.extract_strided_slice %110 {offsets = [0, 128], sizes = [16, 128], strides = [1, 1]} : vector<16x256xf32> to vector<16x128xf32>
    %113 = tpu.concatenate %111, %112 in 0 : vector<16x128xf32>, vector<16x128xf32> -> vector<32x128xf32>
    %114 = arith.truncf %113 : vector<32x128xf32> to vector<32x128xbf16>
    %cst_32 = arith.constant dense<0.000000e+00> : vector<16x128xf32>
    %115 = tpu.matmul %6, %114, %cst_32 {dimension_numbers = #tpu.dot_dimension_numbers<[1], [0], [0], [1], [0, 0, 1, 1], [], []>} : vector<16x32xbf16>, vector<32x128xbf16>, vector<16x128xf32> -> vector<16x128xf32>
    %116 = vector.extract_strided_slice %115 {offsets = [0, 0], sizes = [16, 32], strides = [1, 1]} : vector<16x128xf32> to vector<16x32xf32>
    %c16_33 = arith.constant 16 : index
    %c0_34 = arith.constant 0 : index
    %117 = vector.load %arg2[%c16_33, %c0_34] : memref<96x128xf32, #tpu.memory_space<vmem>>, vector<8x128xf32>
    %118 = vector.extract_strided_slice %117 {offsets = [0, 0], sizes = [1, 32], strides = [1, 1]} : vector<8x128xf32> to vector<1x32xf32>
    %119 = vector.extract_strided_slice %117 {offsets = [1, 0], sizes = [1, 32], strides = [1, 1]} : vector<8x128xf32> to vector<1x32xf32>
    %120 = vector.extract_strided_slice %117 {offsets = [2, 0], sizes = [1, 32], strides = [1, 1]} : vector<8x128xf32> to vector<1x32xf32>
    %121 = vector.extract_strided_slice %117 {offsets = [3, 0], sizes = [1, 32], strides = [1, 1]} : vector<8x128xf32> to vector<1x32xf32>
    %122 = vector.extract_strided_slice %117 {offsets = [4, 0], sizes = [1, 32], strides = [1, 1]} : vector<8x128xf32> to vector<1x32xf32>
    %123 = vector.extract_strided_slice %117 {offsets = [5, 0], sizes = [1, 128], strides = [1, 1]} : vector<8x128xf32> to vector<1x128xf32>
    %124 = arith.addf %108, %116 : vector<16x32xf32>
    %cst_35 = arith.constant dense<0.000000e+00> : vector<16xf32>
    %125 = vector.multi_reduction <add>, %124, %cst_35 [1] : vector<16x32xf32> to vector<16xf32>
    %126 = vector.shape_cast %125 : vector<16xf32> to vector<16x1xf32>
    %cst_36 = arith.constant 3.200000e+01 : f32
    %127 = vector.broadcast %cst_36 : f32 to vector<16x1xf32>
    %128 = arith.divf %126, %127 : vector<16x1xf32>
    %129 = vector.broadcast %128 : vector<16x1xf32> to vector<16x32xf32>
    %130 = arith.subf %124, %129 : vector<16x32xf32>
    %131 = arith.mulf %130, %130 : vector<16x32xf32>
    %cst_37 = arith.constant dense<0.000000e+00> : vector<16xf32>
    %132 = vector.multi_reduction <add>, %131, %cst_37 [1] : vector<16x32xf32> to vector<16xf32>
    %133 = vector.shape_cast %132 : vector<16xf32> to vector<16x1xf32>
    %cst_38 = arith.constant 3.200000e+01 : f32
    %134 = vector.broadcast %cst_38 : f32 to vector<16x1xf32>
    %135 = arith.divf %133, %134 : vector<16x1xf32>
    %cst_39 = arith.constant 9.99999996E-13 : f32
    %136 = vector.broadcast %cst_39 : f32 to vector<16x1xf32>
    %137 = arith.addf %135, %136 : vector<16x1xf32>
    %138 = math.rsqrt %137 : vector<16x1xf32>
    %139 = vector.broadcast %138 : vector<16x1xf32> to vector<16x32xf32>
    %140 = arith.mulf %130, %139 : vector<16x32xf32>
    %141 = vector.broadcast %118 : vector<1x32xf32> to vector<16x32xf32>
    %142 = arith.mulf %140, %141 : vector<16x32xf32>
    %143 = vector.broadcast %119 : vector<1x32xf32> to vector<16x32xf32>
    %144 = arith.addf %142, %143 : vector<16x32xf32>
    %c80 = arith.constant 80 : index
    %c0_40 = arith.constant 0 : index
    %145 = vector.load %arg1[%c80, %c0_40] : memref<368x256xbf16, #tpu.memory_space<vmem>>, vector<32x128xbf16>
    %c240 = arith.constant 240 : index
    %c0_41 = arith.constant 0 : index
    %146 = vector.load %arg1[%c240, %c0_41] : memref<368x256xbf16, #tpu.memory_space<vmem>>, vector<128x32xbf16>
    %147 = arith.truncf %144 : vector<16x32xf32> to vector<16x32xbf16>
    %cst_42 = arith.constant dense<0.000000e+00> : vector<16x128xf32>
    %148 = tpu.matmul %147, %145, %cst_42 {dimension_numbers = #tpu.dot_dimension_numbers<[1], [0], [0], [1], [0, 0, 1, 1], [], []>} : vector<16x32xbf16>, vector<32x128xbf16>, vector<16x128xf32> -> vector<16x128xf32>
    %149 = vector.broadcast %123 : vector<1x128xf32> to vector<16x128xf32>
    %150 = arith.addf %148, %149 : vector<16x128xf32>
    %cst_43 = arith.constant 5.000000e-01 : f32
    %151 = vector.broadcast %cst_43 : f32 to vector<16x128xf32>
    %152 = arith.mulf %151, %150 : vector<16x128xf32>
    %cst_44 = arith.constant 4.471500e-02 : f32
    %153 = vector.broadcast %cst_44 : f32 to vector<16x128xf32>
    %154 = arith.mulf %153, %150 : vector<16x128xf32>
    %155 = arith.mulf %154, %150 : vector<16x128xf32>
    %156 = arith.mulf %155, %150 : vector<16x128xf32>
    %157 = arith.addf %150, %156 : vector<16x128xf32>
    %cst_45 = arith.constant 0.797884583 : f32
    %158 = vector.broadcast %cst_45 : f32 to vector<16x128xf32>
    %159 = arith.mulf %158, %157 : vector<16x128xf32>
    %160 = math.tanh %159 : vector<16x128xf32>
    %cst_46 = arith.constant 1.000000e+00 : f32
    %161 = vector.broadcast %cst_46 : f32 to vector<16x128xf32>
    %162 = arith.addf %161, %160 : vector<16x128xf32>
    %163 = arith.mulf %152, %162 : vector<16x128xf32>
    %164 = arith.truncf %163 : vector<16x128xf32> to vector<16x128xbf16>
    %cst_47 = arith.constant dense<0.000000e+00> : vector<16x32xf32>
    %165 = tpu.matmul %164, %146, %cst_47 {dimension_numbers = #tpu.dot_dimension_numbers<[1], [0], [0], [1], [0, 0, 1, 1], [], []>} : vector<16x128xbf16>, vector<128x32xbf16>, vector<16x32xf32> -> vector<16x32xf32>
    %166 = vector.broadcast %122 : vector<1x32xf32> to vector<16x32xf32>
    %167 = arith.addf %165, %166 : vector<16x32xf32>
    %168 = arith.addf %144, %167 : vector<16x32xf32>
    %cst_48 = arith.constant dense<0.000000e+00> : vector<16xf32>
    %169 = vector.multi_reduction <add>, %168, %cst_48 [1] : vector<16x32xf32> to vector<16xf32>
    %170 = vector.shape_cast %169 : vector<16xf32> to vector<16x1xf32>
    %cst_49 = arith.constant 3.200000e+01 : f32
    %171 = vector.broadcast %cst_49 : f32 to vector<16x1xf32>
    %172 = arith.divf %170, %171 : vector<16x1xf32>
    %173 = vector.broadcast %172 : vector<16x1xf32> to vector<16x32xf32>
    %174 = arith.subf %168, %173 : vector<16x32xf32>
    %175 = arith.mulf %174, %174 : vector<16x32xf32>
    %cst_50 = arith.constant dense<0.000000e+00> : vector<16xf32>
    %176 = vector.multi_reduction <add>, %175, %cst_50 [1] : vector<16x32xf32> to vector<16xf32>
    %177 = vector.shape_cast %176 : vector<16xf32> to vector<16x1xf32>
    %cst_51 = arith.constant 3.200000e+01 : f32
    %178 = vector.broadcast %cst_51 : f32 to vector<16x1xf32>
    %179 = arith.divf %177, %178 : vector<16x1xf32>
    %cst_52 = arith.constant 9.99999996E-13 : f32
    %180 = vector.broadcast %cst_52 : f32 to vector<16x1xf32>
    %181 = arith.addf %179, %180 : vector<16x1xf32>
    %182 = math.rsqrt %181 : vector<16x1xf32>
    %183 = vector.broadcast %182 : vector<16x1xf32> to vector<16x32xf32>
    %184 = arith.mulf %174, %183 : vector<16x32xf32>
    %185 = vector.broadcast %120 : vector<1x32xf32> to vector<16x32xf32>
    %186 = arith.mulf %184, %185 : vector<16x32xf32>
    %187 = vector.broadcast %121 : vector<1x32xf32> to vector<16x32xf32>
    %188 = arith.addf %186, %187 : vector<16x32xf32>
    %cst_53 = arith.constant dense<0.000000e+00> : vector<1x16xf32>
    %189 = tpu.matmul %4, %188, %cst_53 {dimension_numbers = #tpu.dot_dimension_numbers<[1], [1], [0], [0], [0, 0, 1, 0], [], []>} : vector<1x32xf32>, vector<16x32xf32>, vector<1x16xf32> -> vector<1x16xf32>
    %c24 = arith.constant 24 : index
    %c0_54 = arith.constant 0 : index
    %190 = vector.load %arg2[%c24, %c0_54] : memref<96x128xf32, #tpu.memory_space<vmem>>, vector<2x16xf32>
    %cst_55 = arith.constant dense<0.000000e+00> : vector<2x32xf32>
    %191 = tpu.matmul %190, %188, %cst_55 {dimension_numbers = #tpu.dot_dimension_numbers<[1], [0], [0], [1], [0, 0, 1, 1], [], []>} : vector<2x16xf32>, vector<16x32xf32>, vector<2x32xf32> -> vector<2x32xf32>
    %c32 = arith.constant 32 : index
    %c0_56 = arith.constant 0 : index
    %192 = vector.load %arg2[%c32, %c0_56] : memref<96x128xf32, #tpu.memory_space<vmem>>, vector<32x32xf32>
    %cst_57 = arith.constant dense<0.000000e+00> : vector<2x32xf32>
    %193 = tpu.matmul %191, %192, %cst_57 {dimension_numbers = #tpu.dot_dimension_numbers<[1], [0], [0], [1], [0, 0, 1, 1], [], []>} : vector<2x32xf32>, vector<32x32xf32>, vector<2x32xf32> -> vector<2x32xf32>
    %194 = vector.broadcast %3 : vector<1x32xf32> to vector<2x32xf32>
    %195 = arith.addf %193, %194 : vector<2x32xf32>
    %196 = math.tanh %195 : vector<2x32xf32>
    %c64 = arith.constant 64 : index
    %c0_58 = arith.constant 0 : index
    %197 = vector.load %arg2[%c64, %c0_58] : memref<96x128xf32, #tpu.memory_space<vmem>>, vector<32x128xf32>
    %cst_59 = arith.constant dense<0.000000e+00> : vector<2x128xf32>
    %198 = tpu.matmul %196, %197, %cst_59 {dimension_numbers = #tpu.dot_dimension_numbers<[1], [0], [0], [1], [0, 0, 1, 1], [], []>} : vector<2x32xf32>, vector<32x128xf32>, vector<2x128xf32> -> vector<2x128xf32>
    %199 = vector.broadcast %5 : vector<1x128xf32> to vector<2x128xf32>
    %200 = arith.addf %198, %199 : vector<2x128xf32>
    %c0_60 = arith.constant 0 : index
    %c0_61 = arith.constant 0 : index
    %201 = vector.load %arg3[%c0_60, %c0_61] : memref<8x128xf32, #tpu.memory_space<vmem>>, vector<1x16xf32>
    tpu.vector_store %arg3[%c0_60, %c0_61], %189 {strides = array<i32>} : memref<8x128xf32, #tpu.memory_space<vmem>>, vector<1x16xf32>,
    %c1 = arith.constant 1 : index
    %c0_62 = arith.constant 0 : index
    %202 = vector.load %arg3[%c1, %c0_62] : memref<8x128xf32, #tpu.memory_space<vmem>>, vector<2x128xf32>
    tpu.vector_store %arg3[%c1, %c0_62], %200 {strides = array<i32>} : memref<8x128xf32, #tpu.memory_space<vmem>>, vector<2x128xf32>,
    return
  }
}

</mosaic_0001>

<bundles_post_ra>
// kernel: squeeze.1
= control target key start
LH: loop header
LB: loop body
LE: loop exit
PB: predicated region body
PF: predicated region fallthrough
CT: control target
= control target key end

     0   :  { %s85_s0 = inlined_call_operand.vmem [shape: f32[16], index: 0, kind: input, shape index: {}]   ;;  %s86_s1 = inlined_call_operand.hbm [shape: f32[2,8,1], index: 1, kind: output, shape index: {}]  }
   0x1   :  { %v5_v0 = vld [vmem:[%s85_s0] sm:$0x1] }
   0x2   :  { %2 = vsyncpa [#allocation1], 0  ;;  %6 = vst [vmem:[#allocation3] sm:$0x1] %v5_v0  ;;  %vm8_vm0 = vcmask 64512   ;;  %s58_s0 = smov 120  }
   0x3   :  { %s59_s8 = smov [#allocation0]  }
   0x4   :  { %s26_s9 = sshll.u32 %s59_s8, 4  ;;  %s27_s9 = int_to_ptr.vmem [resolvable:$true] %s26_s9 }
   0x5   :  { %s34_s10 = scalar_lea.vmem %s27_s9, 32  ;;  %p39_p1 = scmp.lt.s32.totalorder %s27_s9, %s27_s9 }
   0x6   :  { %p35_p0 = scmp.ne.s32.totalorder %s27_s9, %s34_s10  ;;  %p40_p2 = scmp.lt.s32.totalorder %s34_s10, %s34_s10 }
   0x8   :  { %p41_p3 = por %p40_p2, %p39_p1 }
   0x9   :  { %v10_v1 = vld [vmem:[#allocation3] sm:$0x1]  }
   0xa   :  { %v7_v2 = vld [vmem:[#allocation3] sm:$0x1]   ;;  %11 = vrot.lane.b32.xlu0 %v10_v1, %s58_s0  ;;  %p42_p4 = pnand %p41_p3, %p35_p0 }
   0xb   :  { %9 = vst.msk [vmem:[#allocation2] sm:$0x1] %vm8_vm0, %v7_v2  }
  0x7c   :  { %v12_v3 = vpop.permute.xlu0 %11  }
  0x7d   :  { %15 = vst.msk [vmem:[#allocation2 + $0x1] sm:$0x1] %vm8_vm0, %v12_v3  }
  0x84   :  { %v19_v4 = vld [vmem:[#allocation2] sm:$0x3] }
  0x85   :  { %21 = vst [vmem:[#allocation0] sm:$0x3] %v19_v4 }
  0x86   :  { %45 = shalt.err (!%p42_p4)
}
  0x87   :  { %s46_s13 = scalar_lea.hbm %s86_s1, 32 }
  0x88   :  { %p47_p5 = scmp.ne.s32.totalorder %s86_s1, %s46_s13  ;;  %p50_p6 = scmp.lt.u32.totalorder %s46_s13, %s86_s1 }
  0x8a   :  { %p52_p7 = pnand %p50_p6, %p47_p5 }
  0x8c   :  { %55 = shalt.err (!%p52_p7)
}
  0x8d   :  { %29 = dma.vmem_to_hbm [thread:$0]  %s27_s9, 32, %s86_s1, [#allocation1]  }
  0x8e   :  { %56 = dma.done.wait [#allocation1], 32  }
  0x8f   :  { %57 = vsyncadd [#allocation1], 4294967264 }
  0x90   :  { %31 = vsyncpa [#allocation1], 1 }

// kernel: discriminator_forward.1
= control target key start
LH: loop header
LB: loop body
LE: loop exit
PB: predicated region body
PF: predicated region fallthrough
CT: control target
= control target key end

     0   :  { %vm24_vm0 = vcmask 261120   ;;  %v1416_v18 = vmov 0   ;;  %v52_v23 = vlaneseq  ;;  %v1417_v41 = vmov 0.0   ;;  %s1735_s0 = inlined_call_operand.vmem [shape: f32[16,32], index: 0, kind: input, shape index: {}]   ;;  %s1736_s1 = inlined_call_operand.vmem [shape: bf16[368,256], index: 1, kind: input, shape index: {}]   ;;  %s1737_s2 = inlined_call_operand.vmem [shape: f32[96,128], index: 2, kind: input, shape index: {}]   ;;  %s1738_s3 = inlined_call_operand.vmem [shape: f32[8,128], index: 3, kind: output, shape index: {}]  }
   0x1   :  { %v22_v0 = vld [vmem:[%s1735_s0] sm:$0xff]  ;;  %v23_v1 = vld [vmem:[%s1735_s0 + $0x8] sm:$0xff]  ;;  %v1453_v14 = vld [vmem:[%s1736_s1 + $0x14] ss:$8 sps:$4 sm:$0xff]   ;;  %120 = vmatprep.mubr.bf16.mxu0 %v1416_v18  ;;  %1228 = vmatprep.subr.bf16.mxu1 %v1417_v41  ;;  %vm1418_vm1 = vmmov 0   ;;  %vm901_vm3 = vcmask 130048  }
   0x2   :  { %v25_v2 = vsel %vm24_vm0, %v22_v0, 0.0  ;;  %v28_v3 = vsel %vm24_vm0, %v23_v1, 0.0  ;;  %v1458_v15 = vld [vmem:[%s1736_s1 + $0x10] ss:$8 sps:$4 sm:$0xff]   ;;  %88 = vmatprep.subr.bf16.mxu0 %v1453_v14  ;;  %v1464_v16 = vld [vmem:[%s1736_s1 + $0x24] ss:$8 sps:$4 sm:$0xff]   ;;  %1232 = vmatprep.mubr.msk.bf16.mxu1 %vm1418_vm1, %v1417_v41  ;;  %vm1338_vm2 = vmpackc.low %vm24_vm0, %vm24_vm0 }
   0x3   :  { %26 = vadd.xlane.f32.xlu0 %v25_v2  ;;  %v1469_v17 = vld [vmem:[%s1736_s1 + $0x20] ss:$8 sps:$4 sm:$0xff]   ;;  %89 = vmatpush1.bf16.msra.mxu0 %v1458_v15  ;;  %v1475_v26 = vshrl.u32 %v52_v23, 7  ;;  %vm1138_vm4 = vcmask 122880  }
   0x4   :  { %90 = vmatprep.subr.bf16.mxu0 %v1464_v16  ;;  %v1483_v28 = vld [vmem:[%s1737_s2] sm:$0xff] }
   0x5   :  { %v1478_v27 = vsub.s32 0, %v1475_v26  ;;  %v1488_v32 = vsub.s32 1, %v1475_v26  ;;  %v1503_v48 = vld [vmem:[%s1736_s1] ss:$8 sps:$4 sm:$0xff]  }
   0x7   :  { %29 = vadd.xlane.f32.xlu0 %v28_v3  ;;  %91 = vmatpush1.bf16.msra.mxu0 %v1469_v17  ;;  %v55_v31 = vrot.slane %v1483_v28, %v1478_v27  ;;  %v61_v36 = vrot.slane %v1483_v28, %v1488_v32  ;;  %v1366_v3 = vld [vmem:[%s1736_s1 + $0x30] ss:$8 sps:$4 sm:$0xff]  }
   0x8   :  { %1236 = vmatprep.subr.bf16.mxu0 %v1417_v41 }
  0x90   :  { %v27_v4 = vpop.xlane.xlu0 %26 }
  0x91   :  { %v32_v5 = vmul.f32 0.03125, %v27_v4  ;;  %v1367_v4 = vld [vmem:[%s1736_s1 + $0x40] ss:$8 sps:$4 sm:$0xff]  }
  0x93   :  { %v34_v6 = vsub.f32 %v22_v0, %v32_v5 }
  0x94   :  { %v30_v7 = vpop.xlane.xlu0 %29 }
  0x95   :  { %v33_v8 = vmul.f32 0.03125, %v30_v7  ;;  %v36_v9 = vmul.f32 %v34_v6, %v34_v6 }
  0x97   :  { %v35_v10 = vsub.f32 %v23_v1, %v33_v8  ;;  %v38_v11 = vsel %vm24_vm0, %v36_v9, 0.0 }
  0x98   :  { %39 = vadd.xlane.f32.xlu1 %v38_v11  ;;  %v1525_v11 = vld [vmem:[%s1737_s2 + $0x8] sm:$0xff] }
  0x99   :  { %v37_v12 = vmul.f32 %v35_v10, %v35_v10 }
  0x9b   :  { %v41_v13 = vsel %vm24_vm0, %v37_v12, 0.0  ;;  %v214_v12 = vrot.slane %v1525_v11, %v1478_v27 }
  0x9c   :  { %42 = vadd.xlane.f32.xlu1 %v41_v13 }
 0x125   :  { %v40_v19 = vpop.xlane.xlu1 %39 }
 0x126   :  { %v44_v20 = vmul.f32 0.03125, %v40_v19 }
 0x128   :  { %v46_v21 = vadd.f32 1e-12, %v44_v20 }
 0x129   :  { %v43_v22 = vpop.xlane.xlu1 %42 }
 0x12a   :  { %1386 = vrsqrt.f32 %v46_v21  ;;  %v45_v24 = vmul.f32 0.03125, %v43_v22  ;;  %v220_v22 = vrot.slane %v1525_v11, %v1488_v32 }
 0x12c   :  { %v47_v25 = vadd.f32 1e-12, %v45_v24 }
 0x12e   :  { %1388 = vrsqrt.f32 %v47_v25 }
 0x134   :  { %v1387_v29 = vpop.eup %1386 }
 0x135   :  { %v50_v30 = vmul.f32 %v1387_v29, %v34_v6 }
 0x137   :  { %v56_v35 = vmul.f32 %v55_v31, %v50_v30  ;;  %v1368_v30 = vld [vmem:[%s1736_s1 + $0x70] ss:$8 sps:$4 sm:$0xff]  }
 0x138   :  { %v1389_v33 = vpop.eup %1388 }
 0x139   :  { %v51_v34 = vmul.f32 %v1389_v33, %v35_v10  ;;  %v62_v38 = vadd.f32 %v61_v36, %v56_v35  ;;  %v1374_v33 = vld [vmem:[%s1736_s1 + $0xd0] ss:$8 sps:$4 sm:$0xff]   ;;  %v246_v35 = vsub.s32 5, %v1475_v26 }
 0x13b   :  { %v57_v37 = vmul.f32 %v55_v31, %v51_v34  ;;  %v1369_v31 = vld [vmem:[%s1736_s1 + $0x80] ss:$8 sps:$4 sm:$0xff]  }
 0x13c   :  { %v1375_v34 = vld [vmem:[%s1736_s1 + $0xe0] ss:$8 sps:$4 sm:$0xff]  }
 0x13d   :  { %v63_v39 = vadd.f32 %v61_v36, %v57_v37  ;;  %v247_v36 = vrot.slane %v1525_v11, %v246_v35 }
 0x13f   :  { %v64_v40 = vpack.c.bf16 %v63_v39, %v62_v38 }
 0x141   :  { %1149 = vmatmul.mubr.msk.bf16.vlgmr.msra.gmra.mrb[0].mxu0 %vm24_vm0, %v64_v40 }
 0x142   :  { %1240 = vmatprep.mubr.msk.bf16.mxu0 %vm1418_vm1, %v1417_v41  ;;  %1237 = vmatpush3.bf16.msra.mxu0 %v1366_v3 }
 0x143   :  { %1238 = vmatprep.subr.bf16.mxu0 %v1417_v41 }
 0x146   :  { %1239 = vmatpush3.bf16.msra.mxu0 %v1367_v4 }
 0x147   :  { %460 = vmatprep.subr.bf16.mxu0 %v1453_v14 }
 0x214   :  { %v122_v42 = vpop.f32.mrb[0].mxu0 }
 0x215   :  { %v124_v43 = vpop.f32.mrb[1].mxu0 }
 0x216   :  { %v126_v44 = vpop.f32.mrb[2].mxu0 }
 0x217   :  { %v131_v45 = vpack.c.bf16 %v126_v44, %v122_v42  ;;  %v128_v46 = vpop.f32.mrb[3].mxu0 }
 0x218   :  { %v132_v47 = vpack.c.bf16 %v128_v46, %v124_v43 }
 0x219   :  { %1229 = vmatpush3.bf16.msra.mxu1 %v131_v45 }
 0x21a   :  { %1230 = vmatprep.subr.bf16.mxu1 %v1417_v41 }
 0x21d   :  { %1231 = vmatpush3.bf16.msra.mxu1 %v132_v47 }
 0x21e   :  { %1244 = vmatprep.subr.bf16.mxu1 %v1417_v41 }
 0x220   :  { %1233 = vmatmul.mubr.msk.bf16.vlgmr.msra.gmra.mrb[0].mxu1 %vm24_vm0, %v1503_v48 }
 0x221   :  { %1260 = vmatprep.mubr.msk.bf16.mxu1 %vm1418_vm1, %v1417_v41  ;;  %1245 = vmatpush3.bf16.msra.mxu1 %v1368_v30 }
 0x222   :  { %1246 = vmatprep.subr.bf16.mxu1 %v1417_v41 }
 0x225   :  { %1247 = vmatpush3.bf16.msra.mxu1 %v1369_v31 }
 0x226   :  { %1248 = vmatprep.subr.bf16.mxu1 %v1417_v41 }
 0x2f3   :  { %v175_v49 = vpop.f32.mrb[0].mxu1 }
 0x2f4   :  { %v183_v50 = vadd.f32 %v175_v49, %v62_v38  ;;  %v1234_v51 = vpop.f32.mrb[1].mxu1 }
 0x2f5   :  { %v178_v52 = vpop.f32.mrb[2].mxu1 }
 0x2f6   :  { %v184_v53 = vadd.f32 %v178_v52, %v63_v39  ;;  %v1235_v54 = vpop.f32.mrb[3].mxu1  ;;  %v185_v55 = vsel %vm24_vm0, %v183_v50, 0.0 }
 0x2f7   :  { %186 = vadd.xlane.f32.xlu0 %v185_v55 }
 0x2f8   :  { %v188_v56 = vsel %vm24_vm0, %v184_v53, 0.0 }
 0x2f9   :  { %189 = vadd.xlane.f32.xlu1 %v188_v56 }
 0x384   :  { %v187_v57 = vpop.xlane.xlu0 %186 }
 0x385   :  { %v191_v58 = vmul.f32 0.03125, %v187_v57 }
 0x386   :  { %v190_v59 = vpop.xlane.xlu1 %189 }
 0x387   :  { %v193_v60 = vsub.f32 %v183_v50, %v191_v58  ;;  %v192_v61 = vmul.f32 0.03125, %v190_v59 }
 0x389   :  { %v194_v62 = vsub.f32 %v184_v53, %v192_v61  ;;  %v195_v63 = vmul.f32 %v193_v60, %v193_v60 }
 0x38b   :  { %v197_v0 = vsel %vm24_vm0, %v195_v63, 0.0  ;;  %v196_v1 = vmul.f32 %v194_v62, %v194_v62 }
 0x38c   :  { %198 = vadd.xlane.f32.xlu0 %v197_v0  ;;  %v1581_v0 = vsub.s32 4, %v1475_v26 }
 0x38d   :  { %v200_v2 = vsel %vm24_vm0, %v196_v1, 0.0 }
 0x38e   :  { %201 = vadd.xlane.f32.xlu1 %v200_v2  ;;  %v326_v1 = vrot.slane %v1525_v11, %v1581_v0 }
 0x419   :  { %v199_v5 = vpop.xlane.xlu0 %198 }
 0x41a   :  { %v203_v6 = vmul.f32 0.03125, %v199_v5 }
 0x41b   :  { %v202_v7 = vpop.xlane.xlu1 %201 }
 0x41c   :  { %v205_v8 = vadd.f32 1e-12, %v203_v6  ;;  %v204_v9 = vmul.f32 0.03125, %v202_v7 }
 0x41e   :  { %1390 = vrsqrt.f32 %v205_v8  ;;  %v206_v10 = vadd.f32 1e-12, %v204_v9 }
 0x420   :  { %1392 = vrsqrt.f32 %v206_v10 }
 0x428   :  { %v1391_v13 = vpop.eup %1390 }
 0x429   :  { %v209_v19 = vmul.f32 %v1391_v13, %v193_v60 }
 0x42a   :  { %v1393_v20 = vpop.eup %1392 }
 0x42b   :  { %v215_v14 = vmul.f32 %v214_v12, %v209_v19  ;;  %v210_v21 = vmul.f32 %v1393_v20, %v194_v62 }
 0x42d   :  { %v216_v23 = vmul.f32 %v214_v12, %v210_v21  ;;  %v1531_v24 = vadd.f32 %v220_v22, %v215_v14 }
 0x42f   :  { %v1533_v25 = vadd.f32 %v220_v22, %v216_v23 }
 0x431   :  { %v243_v29 = vpack.c.bf16 %v1533_v25, %v1531_v24 }
 0x433   :  { %1241 = vmatmul.mubr.msk.bf16.vlgmr.msra.gmra.mrb[4].mxu0 %vm24_vm0, %v243_v29 }
 0x434   :  { %461 = vmatpush1.bf16.msra.mxu0 %v1458_v15  ;;  %492 = vmatprep.mubr.bf16.mxu0 %v1416_v18  ;;  %v1370_v15 = vld [vmem:[%s1736_s1 + $0x90] ss:$8 sps:$4 sm:$0xff]   ;;  %v1373_v18 = vld [vmem:[%s1736_s1 + $0xc0] ss:$8 sps:$4 sm:$0xff]  }
 0x435   :  { %462 = vmatprep.subr.bf16.mxu0 %v1464_v16  ;;  %1249 = vmatpush3.bf16.msra.mxu1 %v1370_v15  ;;  %v1371_v16 = vld [vmem:[%s1736_s1 + $0xa0] ss:$8 sps:$4 sm:$0xff]  }
 0x436   :  { %1250 = vmatprep.subr.bf16.mxu1 %v1417_v41 }
 0x438   :  { %463 = vmatpush1.bf16.msra.mxu0 %v1469_v17  ;;  %v1372_v17 = vld [vmem:[%s1736_s1 + $0xb0] ss:$8 sps:$4 sm:$0xff]  }
 0x439   :  { %1264 = vmatprep.subr.bf16.mxu0 %v1417_v41  ;;  %1251 = vmatpush3.bf16.msra.mxu1 %v1371_v16 }
 0x43a   :  { %1252 = vmatprep.subr.bf16.mxu1 %v1417_v41 }
 0x43d   :  { %1253 = vmatpush3.bf16.msra.mxu1 %v1372_v17 }
 0x43e   :  { %1254 = vmatprep.subr.bf16.mxu1 %v1417_v41 }
 0x441   :  { %1255 = vmatpush3.bf16.msra.mxu1 %v1373_v18 }
 0x442   :  { %1256 = vmatprep.subr.bf16.mxu1 %v1417_v41 }
 0x445   :  { %1257 = vmatpush3.bf16.msra.mxu1 %v1374_v33  ;;  %v1592_v33 = vsub.s32 2, %v1475_v26 }
 0x446   :  { %1258 = vmatprep.subr.bf16.mxu1 %v1417_v41 }
 0x449   :  { %1259 = vmatpush3.bf16.msra.mxu1 %v1375_v34  ;;  %v447_v34 = vrot.slane %v1525_v11, %v1592_v33 }
 0x506   :  { %v297_v37 = vpop.f32.mrb[4].mxu0 }
 0x507   :  { %v298_v38 = vadd.f32 %v297_v37, %v247_v36  ;;  %v1242_v39 = vpop.f32.mrb[5].mxu0 }
 0x508   :  { %v300_v40 = vpop.f32.mrb[6].mxu0 }
 0x509   :  { %v306_v42 = vmul.f32 0.044715, %v298_v38  ;;  %v301_v43 = vadd.f32 %v300_v40, %v247_v36  ;;  %v1243_v44 = vpop.f32.mrb[7].mxu0  ;;  %v304_v58 = vmul.f32 0.5, %v298_v38  ;;  %v452_v36 = vsub.s32 3, %v1475_v26  ;;  %v976_v26 = vld [vmem:[%s1737_s2 + $0x28] sm:$0xff] }
 0x50b   :  { %v308_v45 = vmul.f32 %v306_v42, %v298_v38  ;;  %v307_v46 = vmul.f32 0.044715, %v301_v43  ;;  %v305_v59 = vmul.f32 0.5, %v301_v43 }
 0x50d   :  { %v310_v47 = vmul.f32 %v308_v45, %v298_v38  ;;  %v309_v49 = vmul.f32 %v307_v46, %v301_v43 }
 0x50f   :  { %v312_v50 = vadd.f32 %v310_v47, %v298_v38  ;;  %v311_v51 = vmul.f32 %v309_v49, %v301_v43 }
 0x511   :  { %v314_v52 = vmul.f32 0.7978846, %v312_v50  ;;  %v313_v53 = vadd.f32 %v311_v51, %v301_v43  ;;  %v453_v43 = vrot.slane %v1525_v11, %v452_v36 }
 0x513   :  { %1394 = vtanh.f32 %v314_v52  ;;  %v315_v54 = vmul.f32 0.7978846, %v313_v53 }
 0x515   :  { %1396 = vtanh.f32 %v315_v54 }
 0x51d   :  { %v1395_v55 = vpop.eup %1394 }
 0x51e   :  { %v318_v56 = vadd.f32 1.0, %v1395_v55 }
 0x51f   :  { %v1397_v57 = vpop.eup %1396 }
 0x520   :  { %v319_v60 = vadd.f32 1.0, %v1397_v57  ;;  %v320_v61 = vmul.f32 %v318_v56, %v304_v58 }
 0x522   :  { %v321_v62 = vmul.f32 %v319_v60, %v305_v59 }
 0x524   :  { %v322_v63 = vpack.c.bf16 %v321_v62, %v320_v61 }
 0x526   :  { %1261 = vmatmul.mubr.bf16.vlgmr.msra.gmra.mrb[4].mxu1 %v322_v63 }
 0x527   :  { %1304 = vmatprep.mubr.msk.f32.mxu1 %vm1418_vm1, %v1417_v41 }
 0x5f9   :  { %v409_v2 = vpop.f32.mrb[4].mxu1 }
 0x5fa   :  { %v410_v3 = vadd.f32 %v409_v2, %v326_v1  ;;  %v1262_v4 = vpop.f32.mrb[5].mxu1 }
 0x5fb   :  { %v412_v5 = vpop.f32.mrb[6].mxu1 }
 0x5fc   :  { %v413_v6 = vadd.f32 %v412_v5, %v326_v1  ;;  %v1263_v7 = vpop.f32.mrb[7].mxu1  ;;  %v416_v8 = vadd.f32 %v410_v3, %v1531_v24 }
 0x5fe   :  { %v418_v9 = vsel %vm24_vm0, %v416_v8, 0.0  ;;  %v417_v10 = vadd.f32 %v413_v6, %v1533_v25 }
 0x5ff   :  { %419 = vadd.xlane.f32.xlu0 %v418_v9  ;;  %v1377_v9 = vld [vmem:[%s1736_s1 + $0x60] ss:$8 sps:$4 sm:$0xff]  }
 0x600   :  { %v421_v12 = vsel %vm24_vm0, %v417_v10, 0.0 }
 0x601   :  { %422 = vadd.xlane.f32.xlu1 %v421_v12 }
 0x68c   :  { %v420_v13 = vpop.xlane.xlu0 %419 }
 0x68d   :  { %v424_v19 = vmul.f32 0.03125, %v420_v13 }
 0x68e   :  { %v423_v20 = vpop.xlane.xlu1 %422 }
 0x68f   :  { %v426_v14 = vsub.f32 %v416_v8, %v424_v19  ;;  %v425_v21 = vmul.f32 0.03125, %v423_v20  ;;  %v1376_v8 = vld [vmem:[%s1736_s1 + $0x50] ss:$8 sps:$4 sm:$0xff]  }
 0x691   :  { %v427_v22 = vsub.f32 %v417_v10, %v425_v21  ;;  %v428_v23 = vmul.f32 %v426_v14, %v426_v14  ;;  %v1624_v21 = vld [vmem:[%s1737_s2 + $0x10] sm:$0xff] }
 0x693   :  { %v430_v29 = vsel %vm24_vm0, %v428_v23, 0.0  ;;  %v429_v30 = vmul.f32 %v427_v22, %v427_v22 }
 0x694   :  { %431 = vadd.xlane.f32.xlu0 %v430_v29 }
 0x695   :  { %v433_v24 = vsel %vm24_vm0, %v429_v30, 0.0 }
 0x696   :  { %434 = vadd.xlane.f32.xlu1 %v433_v24 }
 0x721   :  { %v432_v31 = vpop.xlane.xlu0 %431 }
 0x722   :  { %v436_v25 = vmul.f32 0.03125, %v432_v31 }
 0x723   :  { %v435_v15 = vpop.xlane.xlu1 %434 }
 0x724   :  { %v438_v16 = vadd.f32 1e-12, %v436_v25  ;;  %v437_v17 = vmul.f32 0.03125, %v435_v15  ;;  %v584_v25 = vrot.slane %v1624_v21, %v1488_v32  ;;  %v1379_v32 = vld [vmem:[%s1736_s1 + $0x100] ss:$8 sps:$4 sm:$0xff]  }
 0x726   :  { %1398 = vrsqrt.f32 %v438_v16  ;;  %v439_v18 = vadd.f32 1e-12, %v437_v17 }
 0x728   :  { %1400 = vrsqrt.f32 %v439_v18 }
 0x730   :  { %v1399_v37 = vpop.eup %1398 }
 0x731   :  { %v442_v38 = vmul.f32 %v1399_v37, %v426_v14  ;;  %v1381_v37 = vld [vmem:[%s1736_s1 + $0x120] ss:$8 sps:$4 sm:$0xff]  }
 0x732   :  { %v1401_v39 = vpop.eup %1400 }
 0x733   :  { %v448_v40 = vmul.f32 %v447_v34, %v442_v38  ;;  %v443_v42 = vmul.f32 %v1401_v39, %v427_v22  ;;  %v578_v22 = vrot.slane %v1624_v21, %v1478_v27  ;;  %v1378_v27 = vld [vmem:[%s1736_s1 + $0xf0] ss:$8 sps:$4 sm:$0xff]   ;;  %v1383_v39 = vld [vmem:[%s1736_s1 + $0x140] ss:$8 sps:$4 sm:$0xff]  }
 0x734   :  { %v1382_v38 = vld [vmem:[%s1736_s1 + $0x130] ss:$8 sps:$4 sm:$0xff]  }
 0x735   :  { %v449_v44 = vmul.f32 %v447_v34, %v443_v42  ;;  %v454_v45 = vadd.f32 %v453_v43, %v448_v40  ;;  %v1380_v34 = vld [vmem:[%s1736_s1 + $0x110] ss:$8 sps:$4 sm:$0xff]   ;;  %v1385_v42 = vld [vmem:[%s1736_s1 + $0x160] ss:$8 sps:$4 sm:$0xff]  }
 0x736   :  { %v1384_v40 = vld [vmem:[%s1736_s1 + $0x150] ss:$8 sps:$4 sm:$0xff]  }
 0x737   :  { %v455_v46 = vadd.f32 %v453_v43, %v449_v44  ;;  %v611_v43 = vrot.slane %v1624_v21, %v246_v35 }
 0x739   :  { %v456_v47 = vpack.c.bf16 %v455_v46, %v454_v45 }
 0x73b   :  { %1163 = vmatmul.mubr.msk.bf16.vlgmr.msra.gmra.mrb[8].mxu0 %vm24_vm0, %v456_v47 }
 0x73c   :  { %1268 = vmatprep.mubr.msk.bf16.mxu0 %vm1418_vm1, %v1417_v41 }
 0x80e   :  { %v494_v49 = vpop.f32.mrb[8].mxu0 }
 0x80f   :  { %v496_v50 = vpop.f32.mrb[9].mxu0 }
 0x810   :  { %v498_v51 = vpop.f32.mrb[10].mxu0 }
 0x811   :  { %v503_v52 = vpack.c.bf16 %v498_v51, %v494_v49  ;;  %v500_v53 = vpop.f32.mrb[11].mxu0 }
 0x812   :  { %v504_v54 = vpack.c.bf16 %v500_v53, %v496_v50 }
 0x813   :  { %1265 = vmatpush3.bf16.msra.mxu0 %v503_v52 }
 0x814   :  { %1266 = vmatprep.subr.bf16.mxu0 %v1417_v41 }
 0x817   :  { %1267 = vmatpush3.bf16.msra.mxu0 %v504_v54 }
 0x818   :  { %1272 = vmatprep.subr.bf16.mxu0 %v1417_v41 }
 0x81a   :  { %1269 = vmatmul.mubr.msk.bf16.vlgmr.msra.gmra.mrb[12].mxu0 %vm24_vm0, %v1503_v48 }
 0x81b   :  { %1276 = vmatprep.mubr.msk.bf16.mxu0 %vm1418_vm1, %v1417_v41  ;;  %1273 = vmatpush3.bf16.msra.mxu0 %v1376_v8 }
 0x81c   :  { %1274 = vmatprep.subr.bf16.mxu0 %v1417_v41 }
 0x81f   :  { %1275 = vmatpush3.bf16.msra.mxu0 %v1377_v9 }
 0x820   :  { %1280 = vmatprep.subr.bf16.mxu0 %v1417_v41 }
 0x8ed   :  { %v539_v11 = vpop.f32.mrb[12].mxu0 }
 0x8ee   :  { %v547_v55 = vadd.f32 %v539_v11, %v454_v45  ;;  %v1270_v56 = vpop.f32.mrb[13].mxu0 }
 0x8ef   :  { %v542_v57 = vpop.f32.mrb[14].mxu0 }
 0x8f0   :  { %v548_v58 = vadd.f32 %v542_v57, %v455_v46  ;;  %v1271_v59 = vpop.f32.mrb[15].mxu0  ;;  %v549_v60 = vsel %vm24_vm0, %v547_v55, 0.0 }
 0x8f1   :  { %550 = vadd.xlane.f32.xlu0 %v549_v60 }
 0x8f2   :  { %v552_v61 = vsel %vm24_vm0, %v548_v58, 0.0 }
 0x8f3   :  { %553 = vadd.xlane.f32.xlu1 %v552_v61 }
 0x97e   :  { %v551_v62 = vpop.xlane.xlu0 %550 }
 0x97f   :  { %v555_v63 = vmul.f32 0.03125, %v551_v62 }
 0x980   :  { %v554_v1 = vpop.xlane.xlu1 %553 }
 0x981   :  { %v557_v2 = vsub.f32 %v547_v55, %v555_v63  ;;  %v556_v48 = vmul.f32 0.03125, %v554_v1 }
 0x983   :  { %v558_v3 = vsub.f32 %v548_v58, %v556_v48  ;;  %v559_v4 = vmul.f32 %v557_v2, %v557_v2 }
 0x985   :  { %v561_v5 = vsel %vm24_vm0, %v559_v4, 0.0  ;;  %v560_v6 = vmul.f32 %v558_v3, %v558_v3  ;;  %v690_v4 = vrot.slane %v1624_v21, %v1581_v0 }
 0x986   :  { %562 = vadd.xlane.f32.xlu0 %v561_v5 }
 0x987   :  { %v564_v7 = vsel %vm24_vm0, %v560_v6, 0.0 }
 0x988   :  { %565 = vadd.xlane.f32.xlu1 %v564_v7 }
 0xa13   :  { %v563_v10 = vpop.xlane.xlu0 %562 }
 0xa14   :  { %v567_v12 = vmul.f32 0.03125, %v563_v10 }
 0xa15   :  { %v566_v13 = vpop.xlane.xlu1 %565 }
 0xa16   :  { %v569_v19 = vadd.f32 1e-12, %v567_v12  ;;  %v568_v20 = vmul.f32 0.03125, %v566_v13 }
 0xa18   :  { %1402 = vrsqrt.f32 %v569_v19  ;;  %v570_v14 = vadd.f32 1e-12, %v568_v20 }
 0xa1a   :  { %1404 = vrsqrt.f32 %v570_v14 }
 0xa22   :  { %v1403_v23 = vpop.eup %1402 }
 0xa23   :  { %v573_v29 = vmul.f32 %v1403_v23, %v557_v2 }
 0xa24   :  { %v1405_v30 = vpop.eup %1404 }
 0xa25   :  { %v579_v24 = vmul.f32 %v578_v22, %v573_v29  ;;  %v574_v31 = vmul.f32 %v1405_v30, %v558_v3 }
 0xa27   :  { %v580_v15 = vmul.f32 %v578_v22, %v574_v31  ;;  %v1630_v16 = vadd.f32 %v584_v25, %v579_v24 }
 0xa29   :  { %v1632_v17 = vadd.f32 %v584_v25, %v580_v15 }
 0xa2b   :  { %v607_v18 = vpack.c.bf16 %v1632_v17, %v1630_v16 }
 0xa2d   :  { %1277 = vmatmul.mubr.msk.bf16.vlgmr.msra.gmra.mrb[16].mxu0 %vm24_vm0, %v607_v18  ;;  %v1419_v18 = vmov 0.0|0.0  }
 0xa2e   :  { %1296 = vmatprep.mubr.msk.bf16.mxu0 %vm1418_vm1, %v1417_v41  ;;  %1281 = vmatpush3.bf16.msra.mxu0 %v1378_v27 }
 0xa2f   :  { %1282 = vmatprep.subr.bf16.mxu0 %v1417_v41  ;;  %1336 = vmatprep.subr.bf16.mxu1 %v1419_v18 }
 0xa32   :  { %1283 = vmatpush3.bf16.msra.mxu0 %v1379_v32 }
 0xa33   :  { %1284 = vmatprep.subr.bf16.mxu0 %v1417_v41 }
 0xa36   :  { %1285 = vmatpush3.bf16.msra.mxu0 %v1380_v34 }
 0xa37   :  { %1286 = vmatprep.subr.bf16.mxu0 %v1417_v41 }
 0xa3a   :  { %1287 = vmatpush3.bf16.msra.mxu0 %v1381_v37 }
 0xa3b   :  { %1288 = vmatprep.subr.bf16.mxu0 %v1417_v41 }
 0xa3e   :  { %1289 = vmatpush3.bf16.msra.mxu0 %v1382_v38 }
 0xa3f   :  { %1290 = vmatprep.subr.bf16.mxu0 %v1417_v41 }
 0xa42   :  { %1291 = vmatpush3.bf16.msra.mxu0 %v1383_v39  ;;  %v811_v39 = vrot.slane %v1624_v21, %v1592_v33 }
 0xa43   :  { %1292 = vmatprep.subr.bf16.mxu0 %v1417_v41 }
 0xa46   :  { %1293 = vmatpush3.bf16.msra.mxu0 %v1384_v40 }
 0xa47   :  { %1294 = vmatprep.subr.bf16.mxu0 %v1417_v41 }
 0xa4a   :  { %1295 = vmatpush3.bf16.msra.mxu0 %v1385_v42 }
 0xb00   :  { %v661_v44 = vpop.f32.mrb[16].mxu0 }
 0xb01   :  { %v662_v45 = vadd.f32 %v661_v44, %v611_v43  ;;  %v1278_v46 = vpop.f32.mrb[17].mxu0 }
 0xb02   :  { %v664_v47 = vpop.f32.mrb[18].mxu0  ;;  %v817_v46 = vrot.slane %v1624_v21, %v452_v36  ;;  %v900_v36 = vld [vmem:[%s1737_s2 + $0x18] sm:$0x3] }
 0xb03   :  { %v670_v49 = vmul.f32 0.044715, %v662_v45  ;;  %v665_v50 = vadd.f32 %v664_v47, %v611_v43  ;;  %v1279_v51 = vpop.f32.mrb[19].mxu0  ;;  %v668_v62 = vmul.f32 0.5, %v662_v45 }
 0xb05   :  { %v672_v52 = vmul.f32 %v670_v49, %v662_v45  ;;  %v671_v53 = vmul.f32 0.044715, %v665_v50  ;;  %v669_v63 = vmul.f32 0.5, %v665_v50 }
 0xb07   :  { %v674_v54 = vmul.f32 %v672_v52, %v662_v45  ;;  %v673_v11 = vmul.f32 %v671_v53, %v665_v50  ;;  %v821_v52 = vrot.slane %v1483_v28, 3  ;;  %v975_v53 = vld [vmem:[%s1737_s2 + $0x20] sm:$0xff] }
 0xb08   :  { %v1344_v21 = vpack.c.bf16 %v976_v26, %v975_v53 }
 0xb09   :  { %v676_v55 = vadd.f32 %v674_v54, %v662_v45  ;;  %v675_v56 = vmul.f32 %v673_v11, %v665_v50  ;;  %v977_v54 = vld [vmem:[%s1737_s2 + $0x30] sm:$0xff]  ;;  %v978_v11 = vld [vmem:[%s1737_s2 + $0x38] sm:$0xff] }
 0xb0b   :  { %v678_v57 = vmul.f32 0.7978846, %v676_v55  ;;  %v677_v58 = vadd.f32 %v675_v56, %v665_v50  ;;  %v1347_v55 = vpack.c.bf16 %v978_v11, %v977_v54 }
 0xb0d   :  { %1406 = vtanh.f32 %v678_v57  ;;  %v679_v59 = vmul.f32 0.7978846, %v677_v58 }
 0xb0f   :  { %1408 = vtanh.f32 %v679_v59 }
 0xb17   :  { %v1407_v60 = vpop.eup %1406 }
 0xb18   :  { %v682_v35 = vadd.f32 1.0, %v1407_v60  ;;  %v1057_v60 = vld [vmem:[%s1737_s2 + $0x40] sm:$0xff] }
 0xb19   :  { %v1409_v61 = vpop.eup %1408 }
 0xb1a   :  { %v683_v1 = vadd.f32 1.0, %v1409_v61  ;;  %v684_v2 = vmul.f32 %v682_v35, %v668_v62  ;;  %v1058_v35 = vld [vmem:[%s1737_s2 + $0x48] sm:$0xff]  ;;  %v1059_v61 = vld [vmem:[%s1737_s2 + $0x50] sm:$0xff] }
 0xb1b   :  { %v1350_v62 = vpack.c.bf16 %v1058_v35, %v1057_v60 }
 0xb1c   :  { %v685_v48 = vmul.f32 %v683_v1, %v669_v63  ;;  %v1060_v63 = vld [vmem:[%s1737_s2 + $0x58] sm:$0xff] }
 0xb1d   :  { %v1353_v1 = vpack.c.bf16 %v1060_v63, %v1059_v61 }
 0xb1e   :  { %v686_v3 = vpack.c.bf16 %v685_v48, %v684_v2 }
 0xb20   :  { %1297 = vmatmul.mubr.bf16.vlgmr.msra.gmra.mrb[20].mxu0 %v686_v3 }
 0xbf3   :  { %v773_v5 = vpop.f32.mrb[20].mxu0 }
 0xbf4   :  { %v774_v6 = vadd.f32 %v773_v5, %v690_v4  ;;  %v1298_v7 = vpop.f32.mrb[21].mxu0  ;;  %v1064_v5 = vrot.slane %v1483_v28, %v1581_v0 }
 0xbf5   :  { %v776_v8 = vpop.f32.mrb[22].mxu0 }
 0xbf6   :  { %v777_v9 = vadd.f32 %v776_v8, %v690_v4  ;;  %v1299_v10 = vpop.f32.mrb[23].mxu0  ;;  %v780_v12 = vadd.f32 %v774_v6, %v1630_v16 }
 0xbf8   :  { %v782_v13 = vsel %vm24_vm0, %v780_v12, 0.0  ;;  %v781_v19 = vadd.f32 %v777_v9, %v1632_v17 }
 0xbf9   :  { %783 = vadd.xlane.f32.xlu0 %v782_v13 }
 0xbfa   :  { %v785_v20 = vsel %vm24_vm0, %v781_v19, 0.0 }
 0xbfb   :  { %786 = vadd.xlane.f32.xlu1 %v785_v20 }
 0xc86   :  { %v784_v14 = vpop.xlane.xlu0 %783 }
 0xc87   :  { %v788_v22 = vmul.f32 0.03125, %v784_v14 }
 0xc88   :  { %v787_v23 = vpop.xlane.xlu1 %786 }
 0xc89   :  { %v790_v29 = vsub.f32 %v780_v12, %v788_v22  ;;  %v789_v30 = vmul.f32 0.03125, %v787_v23 }
 0xc8b   :  { %v791_v24 = vsub.f32 %v781_v19, %v789_v30  ;;  %v792_v31 = vmul.f32 %v790_v29, %v790_v29 }
 0xc8d   :  { %v794_v25 = vsel %vm24_vm0, %v792_v31, 0.0  ;;  %v793_v15 = vmul.f32 %v791_v24, %v791_v24 }
 0xc8e   :  { %795 = vadd.xlane.f32.xlu0 %v794_v25 }
 0xc8f   :  { %v797_v16 = vsel %vm24_vm0, %v793_v15, 0.0 }
 0xc90   :  { %798 = vadd.xlane.f32.xlu1 %v797_v16 }
 0xd1b   :  { %v796_v17 = vpop.xlane.xlu0 %795 }
 0xd1c   :  { %v800_v27 = vmul.f32 0.03125, %v796_v17 }
 0xd1d   :  { %v799_v32 = vpop.xlane.xlu1 %798 }
 0xd1e   :  { %v802_v34 = vadd.f32 1e-12, %v800_v27  ;;  %v801_v37 = vmul.f32 0.03125, %v799_v32 }
 0xd20   :  { %1410 = vrsqrt.f32 %v802_v34  ;;  %v803_v38 = vadd.f32 1e-12, %v801_v37 }
 0xd22   :  { %1412 = vrsqrt.f32 %v803_v38 }
 0xd2a   :  { %v1411_v40 = vpop.eup %1410 }
 0xd2b   :  { %v806_v42 = vmul.f32 %v1411_v40, %v790_v29 }
 0xd2c   :  { %v1413_v43 = vpop.eup %1412 }
 0xd2d   :  { %v812_v44 = vmul.f32 %v811_v39, %v806_v42  ;;  %v807_v45 = vmul.f32 %v1413_v43, %v791_v24 }
 0xd2f   :  { %v813_v47 = vmul.f32 %v811_v39, %v807_v45  ;;  %v818_v49 = vadd.f32 %v817_v46, %v812_v44 }
 0xd31   :  { %v819_v50 = vadd.f32 %v817_v46, %v813_v47 }
 0xd33   :  { %v1337_v51 = vpack.c.bf16 %v819_v50, %v818_v49 }
 0xd35   :  { %1339 = vmatpush3.bf16.xpose.msk.msra.mxu1 %vm1338_vm2, %v1337_v51 }
 0xd36   :  { %1340 = vmatprep.subr.bf16.mxu1 %v1419_v18 }
 0xd3c   :  { %1305 = vmatmul.mubr.msk.f32.vlgmr.msra.gmra.mrb[8].mxu1 %vm24_vm0, %v821_v52 }
 0xd3d   :  { %1342 = vmatpush3.bf16.msra.mxu1 %v1337_v51  ;;  %1311 = vmatprep.mubr.msk.f32.mxu1 %vm1418_vm1, %v1417_v41 }
 0xd3e   :  { %1343 = vmatprep.subr.bf16.mxu1 %v1419_v18 }
 0xd40   :  { %1312 = vmatmul.mubr.msk.f32.vlgmr.msra.gmra.mrb[10].mxu1 %vm901_vm3, %v900_v36 }
 0xd41   :  { %1345 = vmatpush3.bf16.msra.mxu1 %v1344_v21  ;;  %1322 = vmatprep.mubr.msk.f32.mxu1 %vm1418_vm1, %v1417_v41 }
 0xd42   :  { %1346 = vmatprep.subr.bf16.mxu1 %v1419_v18 }
 0xd45   :  { %1348 = vmatpush3.bf16.msra.mxu1 %v1347_v55 }
 0xd46   :  { %1349 = vmatprep.subr.bf16.mxu1 %v1419_v18 }
 0xe0f   :  { %v896_v56 = vpop.f32.mrb[8].mxu1 }
 0xe10   :  { %1139 = vst.msk [vmem:[%s1738_s3] sm:$0x1] %vm1138_vm4, %v896_v56  ;;  %v1306_v57 = vpop.f32.mrb[9].mxu1 }
 0xe13   :  { %v971_v58 = vpop.f32.mrb[10].mxu1 }
 0xe14   :  { %v1313_v59 = vpop.f32.mrb[11].mxu1  ;;  %1323 = vmatmul.mubr.msk.f32.vlgmr.msra.gmra.mrb[12].mxu1 %vm24_vm0, %v971_v58 }
 0xe15   :  { %1333 = vmatprep.mubr.msk.f32.mxu1 %vm1418_vm1, %v1417_v41  ;;  %1351 = vmatpush3.bf16.msra.mxu1 %v1350_v62  ;;  %v982_v41 = vrot.slane %v1483_v28, %v1592_v33 }
 0xe16   :  { %1352 = vmatprep.subr.bf16.mxu1 %v1419_v18 }
 0xe19   :  { %1354 = vmatpush3.bf16.msra.mxu1 %v1353_v1 }
 0xee7   :  { %v1052_v2 = vpop.f32.mrb[12].mxu1 }
 0xee8   :  { %v1053_v48 = vadd.f32 %v1052_v2, %v982_v41  ;;  %v1324_v3 = vpop.f32.mrb[13].mxu1 }
 0xeea   :  { %1414 = vtanh.f32 %v1053_v48 }
 0xef4   :  { %v1415_v4 = vpop.eup %1414 }
 0xef5   :  { %1334 = vmatmul.mubr.msk.f32.vlgmr.msra.gmra.mrb[14].mxu1 %vm24_vm0, %v1415_v4 }
 0xfc8   :  { %v1134_v6 = vpop.f32.mrb[14].mxu1 }
 0xfc9   :  { %v1135_v7 = vadd.f32 %v1134_v6, %v1064_v5  ;;  %v1335_v8 = vpop.f32.mrb[15].mxu1 }
 0xfcb   :  { %1140 = vst [vmem:[%s1738_s3 + $0x1] sm:$0x3] %v1135_v7 }

</bundles_post_ra>
